<compile_context>
chip_gen: v7x
topology: tpu7x:2x2x1
jax: 0.10.0
libtpu: 0.0.40
codegen_flags: <defaults>
</compile_context>

<pallas_src>
import functools

import jax
import jax.numpy as jnp
from jax import lax
from jax.experimental import pallas as pl
from jax.experimental.pallas import tpu as pltpu


def _graph_learner_kernel(emb_ref, w_ref, b_ref, adj_ref, *, alpha, hid):
    # emb_ref: (TB, n, hid); w_ref: (hid, 2*hid) [= concat(W1.T, W2.T)];
    # b_ref: (1, 2*hid); adj_ref: (TB, n, n)
    tb, n, _ = emb_ref.shape

    # One fused linear for the whole TB block: (TB*n, hid) @ (hid, 2*hid) on the MXU.
    x2d = emb_ref[...].reshape(tb * n, hid)
    z2d = jnp.dot(x2d, w_ref[...], preferred_element_type=jnp.float32) + b_ref[...]
    z = jnp.tanh(alpha * z2d).reshape(tb, n, 2 * hid)      # [n1 | n2]

    # Antisymmetric pairwise score in ONE batched matmul:
    #   [n1 | n2] . [n2 | -n1]^T = n1 n2^T - n2 n1^T   (per batch element)
    n1 = z[..., :hid]
    n2 = z[..., hid:]
    zs = jnp.concatenate([n2, -n1], axis=-1)               # (TB, n, 2*hid)
    s = alpha * lax.dot_general(
        z, zs, (((2,), (2,)), ((0,), (0,))),
        preferred_element_type=jnp.float32)                 # (TB, n, n)

    # relu(tanh(.)) + I then clamp(1e-6, 1)  ==  where(diag, 1, clip(tanh, 1e-6, 1)).
    rows = lax.broadcasted_iota(jnp.int32, (n, n), 0)
    cols = lax.broadcasted_iota(jnp.int32, (n, n), 1)
    diag = rows == cols                                     # broadcasts over TB
    a = jnp.where(diag, 1.0, jnp.clip(jnp.tanh(s), 1e-6, 1.0))

    adj_ref[...] = a.astype(adj_ref.dtype)


def _tpu_vmem_and_cores():
    """Best-effort hardware query; conservative fallbacks."""
    vmem_cap = 64 * 1024 * 1024
    n_cores = 1
    try:
        vmem_cap = int(pltpu.get_tpu_info().vmem_capacity_bytes)
    except Exception:
        pass
    try:
        kind = jax.devices()[0].device_kind.lower()
        if "v7" in kind:
            n_cores = 2
    except Exception:
        pass
    return vmem_cap, n_cores


def _pick_batch_block(bs, n, hid, *, budget_bytes, n_cores=1):
    """Largest divisor of bs whose per-step VMEM footprint fits the budget.
    Single-core chips: largest TB wins (grid is a sequential loop).
    Multi-core chips: prefer step counts that are a multiple of n_cores,
    ideally >= 2 per core so each core can still double-buffer."""
    fixed = 2 * (hid * 2 * hid * 4 + 2 * hid * 4)           # fused W + b (x2 buffers)

    def fits(tb):
        per = (2 * tb * n * hid * 4          # emb block, double-buffered
               + 2 * tb * n * n * 4          # adj block, double-buffered
               + 2 * tb * n * 2 * hid * 4    # z and zs intermediates
               + 2 * tb * n * n * 4)         # score + epilogue intermediates
        return fixed + per <= budget_bytes

    divisors = [d for d in range(1, bs + 1) if bs % d == 0 and fits(d)]
    if not divisors:
        return 1
    if n_cores <= 1:
        return max(divisors)

    def pref(tb):
        steps = bs // tb
        return (steps % n_cores == 0 and steps >= 2 * n_cores,
                steps % n_cores == 0,
                tb)
    return max(divisors, key=pref)


def graph_learner(emb, w1, b1, w2, b2, alpha=1.0, batch_block=None):
    """emb: (bs, n, hid) f32; w*: (hid, hid) PyTorch-layout (out, in); b*: (hid,).
    Returns adj (bs, n, n) f32 matching GraphLearner.forward."""
    bs, n, hid = emb.shape

    # Wrapper-side weight prep: pre-transpose and fuse the two linears.
    w_cat = jnp.concatenate([w1.T, w2.T], axis=1)           # (hid, 2*hid)
    b_cat = jnp.concatenate([b1, b2]).reshape(1, 2 * hid)   # (1, 2*hid)

    vmem_cap, n_cores = _tpu_vmem_and_cores()
    vmem_limit = min(vmem_cap * 3 // 4, 96 * 1024 * 1024)   # leave headroom
    block_budget = vmem_limit * 2 // 3

    tb = (batch_block if batch_block is not None
          else _pick_batch_block(bs, n, hid, budget_bytes=block_budget,
                                 n_cores=n_cores))
    assert bs % tb == 0, "batch_block must divide the batch size"
    grid = (bs // tb,)

    kernel = functools.partial(_graph_learner_kernel, alpha=float(alpha), hid=hid)

    return pl.pallas_call(
        kernel,
        out_shape=jax.ShapeDtypeStruct((bs, n, n), jnp.float32),
        grid_spec=pltpu.PrefetchScalarGridSpec(
            num_scalar_prefetch=0,
            grid=grid,
            in_specs=[
                pl.BlockSpec((tb, n, hid), lambda g: (g, 0, 0)),   # emb block
                pl.BlockSpec((hid, 2 * hid), lambda g: (0, 0)),    # fused W
                pl.BlockSpec((1, 2 * hid), lambda g: (0, 0)),      # fused b
            ],
            out_specs=pl.BlockSpec((tb, n, n), lambda g: (g, 0, 0)),
        ),
        compiler_params=pltpu.CompilerParams(
            dimension_semantics=("parallel",),
            vmem_limit_bytes=int(vmem_limit)),
    )(emb, w_cat, b_cat)


def graph_learner_ref(emb, w1, b1, w2, b2, alpha=1.0):
    """Pure-JAX reference matching the PyTorch forward."""
    n1 = jnp.tanh(alpha * (emb @ w1.T + b1))
    n2 = jnp.tanh(alpha * (emb @ w2.T + b2))
    adj = (jnp.einsum("bik,bjk->bij", n1, n2)
           - jnp.einsum("bik,bjk->bij", n2, n1)) * alpha
    adj = jax.nn.relu(jnp.tanh(adj))
    eye = jnp.eye(emb.shape[1], dtype=adj.dtype)[None]
    adj = adj + eye
    return jnp.clip(adj, 1e-6, 1.0)


if __name__ == "__main__":
    bs, n, hid = 2, 8, 32
    alpha = 1.0

    key = jax.random.PRNGKey(0)
    k_emb, k_w1, k_b1, k_w2, k_b2 = jax.random.split(key, 5)

    emb = jax.random.normal(k_emb, (bs, n, hid), dtype=jnp.float32)

    # Deterministic parameter init (uniform(-1/sqrt(hid), 1/sqrt(hid)), like nn.Linear).
    bound = 1.0 / (hid ** 0.5)
    w1 = jax.random.uniform(k_w1, (hid, hid), jnp.float32, -bound, bound)
    b1 = jax.random.uniform(k_b1, (hid,), jnp.float32, -bound, bound)
    w2 = jax.random.uniform(k_w2, (hid, hid), jnp.float32, -bound, bound)
    b2 = jax.random.uniform(k_b2, (hid,), jnp.float32, -bound, bound)

    adj = graph_learner(emb, w1, b1, w2, b2, alpha)
    adj = jax.block_until_ready(adj)

    ref = graph_learner_ref(emb, w1, b1, w2, b2, alpha)
    assert adj.shape == (bs, n, n)
    assert jnp.allclose(adj, ref, atol=1e-5, rtol=1e-5), "mismatch vs reference"

    print("KERNEL_OK")
</pallas_src>

<mosaic_0001>
module attributes {stable_mosaic.version = 11 : i64} {
  func.func @_graph_learner_kernel(%arg0: i32, %arg1: memref<2x8x32xf32, #tpu.memory_space<vmem>>, %arg2: memref<32x64xf32, #tpu.memory_space<vmem>>, %arg3: memref<1x64xf32, #tpu.memory_space<vmem>>, %arg4: memref<2x8x8xf32, #tpu.memory_space<vmem>>) attributes {dimension_semantics = [#tpu.dimension_semantics<parallel>], iteration_bounds = array<i64: 1>, scalar_prefetch = 0 : i64, scratch_operands = 0 : i64, tpu.core_type = #tpu.core_type<tc>, window_params = [{transform_indices = @transform_0, window_bounds = array<i64: 2, 8, 32>}, {pipeline_mode = #tpu.pipeline_mode<synchronous>, transform_indices = @transform_1, window_bounds = array<i64: 32, 64>}, {pipeline_mode = #tpu.pipeline_mode<synchronous>, transform_indices = @transform_2, window_bounds = array<i64: 1, 64>}, {transform_indices = @transform_3, window_bounds = array<i64: 2, 8, 8>}]} {
    %c0 = arith.constant 0 : index
    %c0_0 = arith.constant 0 : index
    %c0_1 = arith.constant 0 : index
    %0 = vector.load %arg1[%c0, %c0_0, %c0_1] : memref<2x8x32xf32, #tpu.memory_space<vmem>>, vector<2x8x32xf32>
    %1 = vector.shape_cast %0 : vector<2x8x32xf32> to vector<16x32xf32>
    %c0_2 = arith.constant 0 : index
    %c0_3 = arith.constant 0 : index
    %2 = vector.load %arg2[%c0_2, %c0_3] : memref<32x64xf32, #tpu.memory_space<vmem>>, vector<32x64xf32>
    %cst = arith.constant dense<0.000000e+00> : vector<16x64xf32>
    %3 = tpu.matmul %1, %2, %cst {dimension_numbers = #tpu.dot_dimension_numbers<[1], [0], [0], [1], [0, 0, 1, 1], [], []>} : vector<16x32xf32>, vector<32x64xf32>, vector<16x64xf32> -> vector<16x64xf32>
    %c0_4 = arith.constant 0 : index
    %c0_5 = arith.constant 0 : index
    %4 = vector.load %arg3[%c0_4, %c0_5] : memref<1x64xf32, #tpu.memory_space<vmem>>, vector<1x64xf32>
    %5 = vector.broadcast %4 : vector<1x64xf32> to vector<16x64xf32>
    %6 = arith.addf %3, %5 : vector<16x64xf32>
    %cst_6 = arith.constant 1.000000e+00 : f32
    %7 = vector.broadcast %cst_6 : f32 to vector<16x64xf32>
    %8 = arith.mulf %7, %6 : vector<16x64xf32>
    %9 = math.tanh %8 : vector<16x64xf32>
    %10 = vector.shape_cast %9 : vector<16x64xf32> to vector<2x8x64xf32>
    %11 = vector.extract_strided_slice %10 {offsets = [0, 0, 0], sizes = [2, 8, 32], strides = [1, 1, 1]} : vector<2x8x64xf32> to vector<2x8x32xf32>
    %12 = vector.extract_strided_slice %10 {offsets = [0, 0, 32], sizes = [2, 8, 32], strides = [1, 1, 1]} : vector<2x8x64xf32> to vector<2x8x32xf32>
    %cst_7 = arith.constant 0.000000e+00 : f32
    %13 = vector.broadcast %cst_7 : f32 to vector<2x8x32xf32>
    %14 = arith.subf %13, %11 : vector<2x8x32xf32>
    %15 = tpu.concatenate %12, %14 in 2 : vector<2x8x32xf32>, vector<2x8x32xf32> -> vector<2x8x64xf32>
    %cst_8 = arith.constant dense<0.000000e+00> : vector<2x8x8xf32>
    %16 = tpu.matmul %10, %15, %cst_8 {dimension_numbers = #tpu.dot_dimension_numbers<[2], [2], [1], [1], [0, 0, 0, 1, 1, 1], [0], [0]>} : vector<2x8x64xf32>, vector<2x8x64xf32>, vector<2x8x8xf32> -> vector<2x8x8xf32>
    %cst_9 = arith.constant 1.000000e+00 : f32
    %17 = vector.broadcast %cst_9 : f32 to vector<2x8x8xf32>
    %18 = arith.mulf %17, %16 : vector<2x8x8xf32>
    %19 = tpu.iota {dimensions = array<i32: 0>} : vector<8x8xi32>
    %20 = tpu.iota {dimensions = array<i32: 1>} : vector<8x8xi32>
    %21 = arith.cmpi eq, %19, %20 : vector<8x8xi32>
    %22 = math.tanh %18 : vector<2x8x8xf32>
    %cst_10 = arith.constant 9.99999997E-7 : f32
    %cst_11 = arith.constant 1.000000e+00 : f32
    %23 = vector.broadcast %cst_10 : f32 to vector<2x8x8xf32>
    %24 = arith.maximumf %23, %22 : vector<2x8x8xf32>
    %25 = vector.broadcast %cst_11 : f32 to vector<2x8x8xf32>
    %26 = arith.minimumf %25, %24 : vector<2x8x8xf32>
    %cst_12 = arith.constant 1.000000e+00 : f32
    %27 = vector.shape_cast %21 : vector<8x8xi1> to vector<1x8x8xi1>
    %28 = vector.broadcast %27 : vector<1x8x8xi1> to vector<2x8x8xi1>
    %29 = vector.broadcast %cst_12 : f32 to vector<2x8x8xf32>
    %30 = arith.select %28, %29, %26 : vector<2x8x8xi1>, vector<2x8x8xf32>
    %c0_13 = arith.constant 0 : index
    %c0_14 = arith.constant 0 : index
    %c0_15 = arith.constant 0 : index
    %31 = vector.load %arg4[%c0_13, %c0_14, %c0_15] : memref<2x8x8xf32, #tpu.memory_space<vmem>>, vector<2x8x8xf32>
    tpu.vector_store %arg4[%c0_13, %c0_14, %c0_15], %30 {strides = array<i32>} : memref<2x8x8xf32, #tpu.memory_space<vmem>>, vector<2x8x8xf32>,
    return
  }
  func.func @transform_0(%arg0: i32) -> (i32, i32, i32) {
    %c0_i32 = arith.constant 0 : i32
    %c0_i32_0 = arith.constant 0 : i32
    %c0_i32_1 = arith.constant 0 : i32
    return %arg0, %c0_i32, %c0_i32_0 : i32, i32, i32
  }
  func.func @transform_1(%arg0: i32) -> (i32, i32) {
    %c0_i32 = arith.constant 0 : i32
    %c0_i32_0 = arith.constant 0 : i32
    %c0_i32_1 = arith.constant 0 : i32
    return %c0_i32, %c0_i32_0 : i32, i32
  }
  func.func @transform_2(%arg0: i32) -> (i32, i32) {
    %c0_i32 = arith.constant 0 : i32
    %c0_i32_0 = arith.constant 0 : i32
    %c0_i32_1 = arith.constant 0 : i32
    return %c0_i32, %c0_i32_0 : i32, i32
  }
  func.func @transform_3(%arg0: i32) -> (i32, i32, i32) {
    %c0_i32 = arith.constant 0 : i32
    %c0_i32_0 = arith.constant 0 : i32
    %c0_i32_1 = arith.constant 0 : i32
    return %arg0, %c0_i32, %c0_i32_0 : i32, i32, i32
  }
}

</mosaic_0001>

<bundles_post_ra>
// kernel: tpu_custom_call.1
= control target key start
LH: loop header
LB: loop body
LE: loop exit
PB: predicated region body
PF: predicated region fallthrough
CT: control target
= control target key end

     0   :  { %8 = vsyncpa [#allocation3], 0  ;;  %s565_s0 = inlined_call_operand.hbm [shape: f32[2,8,32], index: 0, kind: input, shape index: {}]   ;;  %s566_s1 = inlined_call_operand.hbm [shape: f32[32,64], index: 1, kind: input, shape index: {}]   ;;  %s567_s2 = inlined_call_operand.vmem [shape: f32[1,64], index: 2, kind: input, shape index: {}]   ;;  %s568_s3 = inlined_call_operand.hbm [shape: f32[2,8,8], index: 3, kind: output, shape index: {}]  }
   0x1   :  { %9 = vsyncpa [#allocation6], 0 }
   0x2   :  { %10 = vsyncpa [#allocation4], 0  ;;  %s482_s12 = smov [#allocation2]   ;;  %s410_s16 = scalar_lea.hbm %s565_s0, 256 }
   0x3   :  { %s16_s13 = sshll.u32 %s482_s12, 4  ;;  %p411_p0 = scmp.ne.s32.totalorder %s565_s0, %s410_s16  ;;  %s17_s13 = int_to_ptr.vmem [resolvable:$true] %s16_s13 }
   0x4   :  { %p414_p1 = scmp.lt.u32.totalorder %s410_s16, %s565_s0 }
   0x6   :  { %p416_p2 = pnand %p414_p1, %p411_p0 }
   0x8   :  { %419 = shalt.err (!%p416_p2)
}
   0x9   :  { %s420_s21 = scalar_lea.vmem %s17_s13, 256  ;;  %p425_p4 = scmp.lt.s32.totalorder %s17_s13, %s17_s13 }
   0xa   :  { %p421_p3 = scmp.ne.s32.totalorder %s17_s13, %s420_s21  ;;  %p426_p5 = scmp.lt.s32.totalorder %s420_s21, %s420_s21 }
   0xc   :  { %p427_p6 = por %p426_p5, %p425_p4 }
   0xe   :  { %p428_p7 = pnand %p427_p6, %p421_p3 }
  0x10   :  { %431 = shalt.err (!%p428_p7)
}
  0x11   :  { %s483_s22 = smov 128   ;;  %s484_s23 = smov 8  }
  0x12   :  { %22 = dma.hbm_to_vmem [thread:$0]  %s565_s0, 256, %s17_s13, [#allocation3], %s483_s22, %s483_s22, %s484_s23  }
  0x13   :  { %s485_s26 = smov [#allocation5]   ;;  %s432_s30 = scalar_lea.hbm %s566_s1, 512 }
  0x14   :  { %s28_s27 = sshll.u32 %s485_s26, 4  ;;  %p433_p8 = scmp.ne.s32.totalorder %s566_s1, %s432_s30  ;;  %s29_s27 = int_to_ptr.vmem [resolvable:$true] %s28_s27 }
  0x15   :  { %p436_p9 = scmp.lt.u32.totalorder %s432_s30, %s566_s1 }
  0x17   :  { %p438_p10 = pnand %p436_p9, %p433_p8 }
  0x19   :  { %441 = shalt.err (!%p438_p10)
}
  0x1a   :  { %s442_s8 = scalar_lea.vmem %s29_s27, 512  ;;  %p447_p12 = scmp.lt.s32.totalorder %s29_s27, %s29_s27 }
  0x1b   :  { %p443_p11 = scmp.ne.s32.totalorder %s29_s27, %s442_s8  ;;  %p448_p13 = scmp.lt.s32.totalorder %s442_s8, %s442_s8 }
  0x1d   :  { %p449_p0 = por %p448_p13, %p447_p12 }
  0x1f   :  { %p450_p1 = pnand %p449_p0, %p443_p11 }
  0x21   :  { %453 = shalt.err (!%p450_p1)
}
  0x22   :  { %34 = dma.hbm_to_vmem [thread:$0]  %s566_s1, 512, %s29_s27, [#allocation6], %s483_s22, %s483_s22, %s484_s23  }
  0x23   :  { %476 = dma.done.wait [#allocation3], 256  }
  0x24   :  { %477 = vsyncadd [#allocation3], 4294967040 }
  0x25   :  { %478 = dma.done.wait [#allocation6], 512  }
  0x26   :  { %479 = vsyncadd [#allocation6], 4294966784  ;;  %vm56_vm0 = vcmask 261120   ;;  %v45_v0 = vld [vmem:[#allocation5] sm:$0xff]  ;;  %v46_v1 = vld [vmem:[#allocation5 + $0x8] sm:$0xff]  ;;  %v486_v13 = vmov 0.0   ;;  %v311_v28 = vlaneseq }
  0x27   :  { %v47_v2 = vld [vmem:[#allocation5 + $0x10] sm:$0xff]  ;;  %v385_v3 = vpack.c.bf16 %v46_v1, %v45_v0  ;;  %v48_v4 = vld [vmem:[#allocation5 + $0x18] sm:$0xff]  ;;  %375 = vmatprep.subr.mxu1 %v486_v13  ;;  %vm487_vm1 = vmmov 0   ;;  %s488_s11 = smov 96   ;;  %s489_s12 = smov 32   ;;  %vm160_vm2 = vcmask 523264  }
  0x28   :  { %v43_v5 = vld [vmem:[#allocation2] sm:$0xff]  ;;  %v389_v6 = vpack.c.bf16 %v48_v4, %v47_v2  ;;  %v44_v7 = vld [vmem:[#allocation2 + $0x8] sm:$0xff]  ;;  %377 = vmatprep.mubr.msk.f32.mxu1 %vm487_vm1, %v486_v13  ;;  %v312_v29 = vshrl.u32 %v311_v28, 7  ;;  %v314_v30 = vand.u32 127, %v311_v28  ;;  %vm326_vm4 = vcmask 64512  }
  0x29   :  { %372 = vmatprep.mubr.msk.f32.mxu0 %vm56_vm0, %v43_v5  ;;  %386 = vmatprep.subr.bf16.mxu0 %v385_v3  ;;  %v347_v8 = vld [vmem:[%s567_s2] ss:$0 sm:$0xff]  ;;  %s490_s2 = smov [#allocation7]  }
  0x2a   :  { %388 = vmatpush3.bf16.msra.mxu0 %v385_v3  ;;  %vm315_vm3 = vcmp.eq.s32.totalorder %v312_v29, %v314_v30  ;;  %s334_s13 = sshll.u32 %s490_s2, 4  ;;  %s335_s13 = int_to_ptr.vmem [resolvable:$true] %s334_s13 }
  0x2b   :  { %390 = vmatprep.subr.bf16.mxu0 %v389_v6  ;;  %s454_s14 = scalar_lea.vmem %s335_s13, 256  ;;  %p459_p3 = scmp.lt.s32.totalorder %s335_s13, %s335_s13 }
  0x2c   :  { %p455_p2 = scmp.ne.s32.totalorder %s335_s13, %s454_s14  ;;  %p460_p4 = scmp.lt.s32.totalorder %s454_s14, %s454_s14 }
  0x2e   :  { %392 = vmatpush3.bf16.msra.mxu0 %v389_v6  ;;  %p461_p5 = por %p460_p4, %p459_p3 }
  0x30   :  { %p462_p6 = pnand %p461_p5, %p455_p2 }
  0x31   :  { %373 = vmatmul.mubr.msk.f32.vlgmr.msra.gmra.mrb[0].mxu0 %vm56_vm0, %v44_v7 }
 0x104   :  { %v374_v9 = vpop.f32.mrb[0].mxu0 }
 0x105   :  { %v135_v10 = vadd.f32 %v374_v9, %v347_v8  ;;  %v129_v11 = vpop.f32.mrb[1].mxu0 }
 0x106   :  { %v130_v12 = vadd.f32 %v347_v8, %v129_v11 }
 0x107   :  { %402 = vtanh.f32 %v135_v10 }
 0x108   :  { %404 = vtanh.f32 %v130_v12 }
 0x111   :  { %v403_v14 = vpop.eup %402 }
 0x112   :  { %v405_v15 = vpop.eup %404  ;;  %146 = vrot.lane.b32.xlu1 %v403_v14, %s488_s11  ;;  %v141_v16 = vsub.f32 0.0, %v403_v14 }
 0x113   :  { %144 = vrot.lane.b32.xlu0 %v405_v15, %s488_s11  ;;  %v140_v17 = vsub.f32 0.0, %v405_v15 }
 0x116   :  { %154 = vrot.lane.b32.xlu1 %v141_v16, %s489_s12 }
 0x117   :  { %152 = vrot.lane.b32.xlu0 %v140_v17, %s489_s12 }
 0x184   :  { %v147_v18 = vpop.permute.xlu1 %146 }
 0x185   :  { %v145_v19 = vpop.permute.xlu0 %144 }
 0x188   :  { %v155_v22 = vpop.permute.xlu1 %154 }
 0x189   :  { %v153_v20 = vpop.permute.xlu0 %152  ;;  %v159_v23 = vsel %vm56_vm0, %v147_v18, %v155_v22 }
 0x18a   :  { %v158_v21 = vsel %vm56_vm0, %v145_v19, %v153_v20 }
 0x18b   :  { %376 = vmatpush3.xpose.msk.msra.mxu1 %vm160_vm2, %v158_v21 }
 0x18c   :  { %380 = vmatprep.subr.mxu1 %v486_v13 }
 0x18e   :  { %378 = vmatmul.mubr.msk.f32.vlgmr.msra.gmra.mrb[0].mxu1 %vm160_vm2, %v405_v15 }
 0x18f   :  { %381 = vmatpush3.xpose.msk.msra.mxu1 %vm160_vm2, %v159_v23  ;;  %382 = vmatprep.mubr.msk.f32.mxu1 %vm487_vm1, %v486_v13 }
 0x192   :  { %383 = vmatmul.mubr.msk.f32.vlgmr.msra.gmra.mrb[2].mxu1 %vm160_vm2, %v403_v14 }
 0x261   :  { %v232_v24 = vpop.f32.mrb[0].mxu1 }
 0x262   :  { %406 = vtanh.f32 %v232_v24  ;;  %v379_v25 = vpop.f32.mrb[1].mxu1 }
 0x265   :  { %v307_v26 = vpop.f32.mrb[2].mxu1 }
 0x266   :  { %408 = vtanh.f32 %v307_v26  ;;  %v384_v27 = vpop.f32.mrb[3].mxu1 }
 0x26c   :  { %v407_v31 = vpop.eup %406 }
 0x26d   :  { %v318_v32 = vmax.f32 %v407_v31, 1e-06 }
 0x26f   :  { %v320_v33 = vmin.f32 %v318_v32, 1.0 }
 0x270   :  { %v409_v34 = vpop.eup %408 }
 0x271   :  { %v319_v35 = vmax.f32 %v409_v34, 1e-06  ;;  %v324_v36 = vsel %vm315_vm3, 1.0, %v320_v33 }
 0x272   :  { %327 = vst.msk [vmem:[#allocation7] sm:$0xff] %vm326_vm4, %v324_v36 }
 0x273   :  { %v321_v37 = vmin.f32 %v319_v35, 1.0 }
 0x275   :  { %v325_v38 = vsel %vm315_vm3, 1.0, %v321_v37 }
 0x276   :  { %328 = vst.msk [vmem:[#allocation7 + $0x8] sm:$0xff] %vm326_vm4, %v325_v38 }
 0x277   :  { %465 = shalt.err (!%p462_p6)
}
 0x278   :  { %s466_s17 = scalar_lea.hbm %s568_s3, 256 }
 0x279   :  { %p467_p7 = scmp.ne.s32.totalorder %s568_s3, %s466_s17  ;;  %p470_p8 = scmp.lt.u32.totalorder %s466_s17, %s568_s3 }
 0x27b   :  { %p472_p9 = pnand %p470_p8, %p467_p7 }
 0x27d   :  { %475 = shalt.err (!%p472_p9)
}
 0x27e   :  { %340 = dma.vmem_to_hbm [thread:$0]  %s335_s13, 256, %s568_s3, [#allocation4], %s483_s22, %s483_s22, %s484_s23  }
 0x27f   :  { %480 = dma.done.wait [#allocation4], 256  }
 0x280   :  { %481 = vsyncadd [#allocation4], 4294967040 }
 0x281   :  { %344 = vsyncpa [#allocation3], 1 }
 0x282   :  { %345 = vsyncpa [#allocation6], 1 }
 0x283   :  { %346 = vsyncpa [#allocation4], 1 }

</bundles_post_ra>
